<compile_context>
chip_gen: v5e
topology: v5e:2x2
jax: 0.10.0
libtpu: 0.0.40
codegen_flags: <defaults>
</compile_context>

<pallas_src>
import jax
import jax.numpy as jnp
from jax.experimental import pallas as pl
from jax.experimental.pallas import tpu as pltpu


def _mlp_kernel(xt_ref, t_ref, w1t_ref, w1time_ref, b1_ref,
                w2_ref, b2_ref, w3_ref, b3_ref, o_ref):
    """Whole 3-layer MLP for one row tile.

    xt_ref:     (tm, D)     bf16   text features
    t_ref:      (1, 1, tm)  f32    time embedding, lane-dense row
    w1t_ref:    (D, H)      bf16   first-layer weights for the text features
    w1time_ref: (1, H)      f32    first-layer weights for the time column
    b1/b2:      (1, H)      f32
    w3_ref:     (1, H)      f32    last-layer weights as a row
    b3_ref:     (1, 1)      f32
    o_ref:      (1, 1, tm)  f32    lane-dense output row
    """
    # Layer 1: aligned K=D bf16 MXU matmul with f32 accumulation; the time
    # column contributes a rank-1 update on the VPU.  The lane-dense time row
    # is turned into a column with a cheap XLU transpose.
    h1 = jnp.dot(xt_ref[...], w1t_ref[...], preferred_element_type=jnp.float32)
    t_col = t_ref[0].T                                            # (1,tm) -> (tm,1)
    h1 = h1 + t_col * w1time_ref[...] + b1_ref[...]
    h1 = jnp.maximum(h1, 0.0)                                     # ReLU (f32)

    # Layer 2: bf16 MXU matmul, f32 accumulation.
    h2 = jnp.dot(h1.astype(jnp.bfloat16), w2_ref[...],
                 preferred_element_type=jnp.float32)
    h2 = jnp.maximum(h2 + b2_ref[...], 0.0)                       # ReLU (f32)

    # Layer 3 (H -> 1): lane reduce instead of an N=1 MXU matmul, then store
    # the result as a lane-dense (1, tm) row (contiguous, unmasked writeback).
    logit = jnp.sum(h2 * w3_ref[...], axis=-1, keepdims=True) + b3_ref[...]
    o_ref[0] = jax.nn.sigmoid(logit).T                            # (tm,1) -> (1,tm)


def init_params(key, input_dim, hidden_dim, dtype=jnp.float32):
    """PyTorch-style uniform(+-1/sqrt(fan_in)) init.

    Weights are returned as (in_features, out_features)."""
    d_in = input_dim + 1
    k1, k2, k3, k4, k5, k6 = jax.random.split(key, 6)

    def lin(kw, kb, fan_in, fan_out):
        bound = 1.0 / jnp.sqrt(fan_in)
        w = jax.random.uniform(kw, (fan_in, fan_out), dtype, -bound, bound)
        b = jax.random.uniform(kb, (1, fan_out), dtype, -bound, bound)
        return w, b

    w1, b1 = lin(k1, k2, d_in, hidden_dim)
    w2, b2 = lin(k3, k4, hidden_dim, hidden_dim)
    w3, b3 = lin(k5, k6, hidden_dim, 1)
    return (w1, b1, w2, b2, w3, b3)


def _vmem_capacity_bytes():
    """Physical VMEM per TensorCore (trace-time query); conservative fallback."""
    try:
        info = pltpu.get_tpu_info()
        cap = getattr(info, "vmem_capacity_bytes", None)
        if cap:
            return int(cap)
    except Exception:
        pass
    return 64 << 20  # unknown chip: assume v7x-like (smallest VMEM, 2 TCs)


def ambiguity_predictor_forward(text_encoding, time_embedding, params, *, tm=None):
    """text_encoding: (..., input_dim), time_embedding: (..., 1) -> (..., 1).

    tm=None picks a chip-aware row tile (4096 on v5e/v6e, 2048 on v7x)."""
    w1, b1, w2, b2, w3, b3 = params
    D = text_encoding.shape[-1]
    H = w1.shape[1]
    assert w1.shape[0] == D + 1, "w1 must have in_features == input_dim + 1"

    lead = text_encoding.shape[:-1]
    # No concat: two separate, cheaply-cast input streams (fused under jit).
    xt = text_encoding.reshape(-1, D).astype(jnp.bfloat16)   # dominant HBM stream
    tt = time_embedding.reshape(-1).astype(jnp.float32)      # (M,) scalar-per-row
    M = xt.shape[0]

    # Split W1 and cast the matmul operands to bf16; small operands stay f32.
    w1t = w1[:D, :].astype(jnp.bfloat16)           # (D, H)
    w1time = w1[D:, :].reshape(1, H).astype(jnp.float32)
    b1f = b1.reshape(1, H).astype(jnp.float32)
    w2b = w2.astype(jnp.bfloat16)                  # (H, H)
    b2f = b2.reshape(1, H).astype(jnp.float32)
    w3row = w3.reshape(1, H).astype(jnp.float32)
    b3f = b3.reshape(1, 1).astype(jnp.float32)

    # --- chip-aware tile sizing ------------------------------------------
    # v5e/v6e: 128 MiB physical VMEM -> bigger tiles + higher scoped limit.
    # v7x:      64 MiB physical VMEM, 2 TensorCores -> cap tm, balance grid.
    vmem_cap = _vmem_capacity_bytes()
    big_vmem = vmem_cap >= (96 << 20)
    tm_max = 4096 if big_vmem else 2048
    vmem_limit = (64 << 20) if big_vmem else (40 << 20)
    balance_even = not big_vmem            # 2 TCs share the "parallel" axis

    if tm is None:
        tm = tm_max
    tm = min(int(tm), tm_max)
    if tm >= M:
        tm = M                              # single full-array tile
    else:
        # bf16 minimum sublane tile is (16,128): keep tm a multiple of 16.
        tm = max(16, (tm // 16) * 16)
        if tm >= M:
            tm = M
    num_tiles = pl.cdiv(M, tm)

    # v7x: an odd step count leaves one TensorCore idle for up to half the
    # time; round the grid up to an even length when that is possible.
    if balance_even and num_tiles > 1 and num_tiles % 2 == 1:
        tm_bal = max(16, ((pl.cdiv(M, num_tiles + 1) + 15) // 16) * 16)
        if pl.cdiv(M, tm_bal) % 2 == 0:
            tm = tm_bal
            num_tiles = pl.cdiv(M, tm)

    # Lane-dense time / output slabs: (num_tiles, 1, tm); blocks (1,1,tm).
    M_pad = num_tiles * tm
    if M_pad != M:
        tt = jnp.pad(tt, (0, M_pad - M))
    tt = tt.reshape(num_tiles, 1, tm)

    cost = pl.CostEstimate(
        flops=2 * M * (D * H + H * H + H),
        transcendentals=M,
        bytes_accessed=(M * D * 2 + M * 4 + M * 4
                        + (D * H + H * H) * 2 + (3 * H + 2) * 4),
    )

    out = pl.pallas_call(
        _mlp_kernel,
        out_shape=jax.ShapeDtypeStruct((num_tiles, 1, tm), jnp.float32),
        grid=(num_tiles,),
        in_specs=[
            pl.BlockSpec((tm, D), lambda i: (i, 0)),        # text tile (pipelined)
            pl.BlockSpec((1, 1, tm), lambda i: (i, 0, 0)),  # time row (lane-dense)
            pl.BlockSpec((D, H), lambda i: (0, 0)),         # w1_text (resident)
            pl.BlockSpec((1, H), lambda i: (0, 0)),         # w1_time
            pl.BlockSpec((1, H), lambda i: (0, 0)),         # b1
            pl.BlockSpec((H, H), lambda i: (0, 0)),         # w2
            pl.BlockSpec((1, H), lambda i: (0, 0)),         # b2
            pl.BlockSpec((1, H), lambda i: (0, 0)),         # w3 row
            pl.BlockSpec((1, 1), lambda i: (0, 0)),         # b3
        ],
        out_specs=pl.BlockSpec((1, 1, tm), lambda i: (i, 0, 0)),  # lane-dense out
        compiler_params=pltpu.CompilerParams(
            dimension_semantics=("parallel",),
            vmem_limit_bytes=vmem_limit),
        cost_estimate=cost,
    )(xt, tt, w1t, w1time, b1f, w2b, b2f, w3row, b3f)

    # Drop padded rows and restore the caller's leading dims.
    return out.reshape(M_pad)[:M].reshape(*lead, 1)


def _reference(text_encoding, time_embedding, params):
    """Pure-JAX f32 reference matching the PyTorch module."""
    w1, b1, w2, b2, w3, b3 = params
    x = jnp.concatenate([text_encoding, time_embedding], axis=-1).astype(jnp.float32)
    h1 = jnp.maximum(x @ w1 + b1[0], 0.0)
    h2 = jnp.maximum(h1 @ w2 + b2[0], 0.0)
    return jax.nn.sigmoid(h2 @ w3 + b3[0])


if __name__ == "__main__":
    # Small shapes consistent with the module: batch=2, seq=32,
    # input_dim=32 (stands in for 768), hidden_dim=32 (stands in for 256).
    B, S, INPUT_DIM, HIDDEN_DIM = 2, 32, 32, 32

    key = jax.random.PRNGKey(0)
    k_text, k_time, k_params = jax.random.split(key, 3)

    text_encoding = jax.random.normal(k_text, (B, S, INPUT_DIM), jnp.float32)
    time_embedding = jax.random.normal(k_time, (B, S, 1), jnp.float32)
    params = init_params(k_params, INPUT_DIM, HIDDEN_DIM)

    y_ref = _reference(text_encoding, time_embedding, params)

    # 1) tm=16 -> a 4-step (even) multi-tile "parallel" grid at this demo size.
    y = ambiguity_predictor_forward(text_encoding, time_embedding, params, tm=16)
    y = jax.block_until_ready(y)
    assert y.shape == (B, S, 1), y.shape
    # bf16 matmul operands with f32 accumulation -> loose tolerance vs f32 ref.
    assert jnp.allclose(y, y_ref, atol=2e-2, rtol=0.0), "mismatch (tm=16)"

    # 2) tm=48 -> ragged last block (M=64, M_pad=96): exercises padded rows
    #    being computed and then sliced away in the wrapper.
    y2 = ambiguity_predictor_forward(text_encoding, time_embedding, params, tm=48)
    y2 = jax.block_until_ready(y2)
    assert y2.shape == (B, S, 1), y2.shape
    assert jnp.allclose(y2, y_ref, atol=2e-2, rtol=0.0), "mismatch (tm=48)"

    print("KERNEL_OK")
</pallas_src>

<mosaic_0001>
module attributes {stable_mosaic.version = 11 : i64} {
  func.func @_mlp_kernel(%arg0: i32, %arg1: memref<16x32xbf16, #tpu.memory_space<vmem>>, %arg2: memref<1x1x16xf32, #tpu.memory_space<vmem>>, %arg3: memref<32x32xbf16, #tpu.memory_space<vmem>>, %arg4: memref<1x32xf32, #tpu.memory_space<vmem>>, %arg5: memref<1x32xf32, #tpu.memory_space<vmem>>, %arg6: memref<32x32xbf16, #tpu.memory_space<vmem>>, %arg7: memref<1x32xf32, #tpu.memory_space<vmem>>, %arg8: memref<1x32xf32, #tpu.memory_space<vmem>>, %arg9: memref<1x1xf32, #tpu.memory_space<vmem>>, %arg10: memref<1x1x16xf32, #tpu.memory_space<vmem>>) attributes {dimension_semantics = [#tpu.dimension_semantics<parallel>], iteration_bounds = array<i64: 4>, scalar_prefetch = 0 : i64, scratch_operands = 0 : i64, tpu.core_type = #tpu.core_type<tc>, window_params = [{transform_indices = @transform_0, window_bounds = array<i64: 16, 32>}, {transform_indices = @transform_1, window_bounds = array<i64: 1, 1, 16>}, {pipeline_mode = #tpu.pipeline_mode<synchronous>, transform_indices = @transform_2, window_bounds = array<i64: 32, 32>}, {pipeline_mode = #tpu.pipeline_mode<synchronous>, transform_indices = @transform_3, window_bounds = array<i64: 1, 32>}, {pipeline_mode = #tpu.pipeline_mode<synchronous>, transform_indices = @transform_4, window_bounds = array<i64: 1, 32>}, {pipeline_mode = #tpu.pipeline_mode<synchronous>, transform_indices = @transform_5, window_bounds = array<i64: 32, 32>}, {pipeline_mode = #tpu.pipeline_mode<synchronous>, transform_indices = @transform_6, window_bounds = array<i64: 1, 32>}, {pipeline_mode = #tpu.pipeline_mode<synchronous>, transform_indices = @transform_7, window_bounds = array<i64: 1, 32>}, {pipeline_mode = #tpu.pipeline_mode<synchronous>, transform_indices = @transform_8, window_bounds = array<i64: 1, 1>}, {transform_indices = @transform_9, window_bounds = array<i64: 1, 1, 16>}]} {
    %c0 = arith.constant 0 : index
    %c0_0 = arith.constant 0 : index
    %0 = vector.load %arg1[%c0, %c0_0] : memref<16x32xbf16, #tpu.memory_space<vmem>>, vector<16x32xbf16>
    %c0_1 = arith.constant 0 : index
    %c0_2 = arith.constant 0 : index
    %1 = vector.load %arg3[%c0_1, %c0_2] : memref<32x32xbf16, #tpu.memory_space<vmem>>, vector<32x32xbf16>
    %cst = arith.constant dense<0.000000e+00> : vector<16x32xf32>
    %2 = tpu.matmul %0, %1, %cst {dimension_numbers = #tpu.dot_dimension_numbers<[1], [0], [0], [1], [0, 0, 1, 1], [], []>} : vector<16x32xbf16>, vector<32x32xbf16>, vector<16x32xf32> -> vector<16x32xf32>
    %c0_3 = arith.constant 0 : index
    %c0_4 = arith.constant 0 : index
    %c0_5 = arith.constant 0 : index
    %3 = vector.load %arg2[%c0_3, %c0_4, %c0_5] : memref<1x1x16xf32, #tpu.memory_space<vmem>>, vector<1x1x16xf32>
    %4 = vector.shape_cast %3 : vector<1x1x16xf32> to vector<1x16xf32>
    %5 = tpu.transpose %4, [1, 0] : vector<1x16xf32> -> vector<16x1xf32>
    %c0_6 = arith.constant 0 : index
    %c0_7 = arith.constant 0 : index
    %6 = vector.load %arg4[%c0_6, %c0_7] : memref<1x32xf32, #tpu.memory_space<vmem>>, vector<1x32xf32>
    %7 = vector.broadcast %5 : vector<16x1xf32> to vector<16x32xf32>
    %8 = vector.broadcast %6 : vector<1x32xf32> to vector<16x32xf32>
    %9 = arith.mulf %7, %8 : vector<16x32xf32>
    %10 = arith.addf %2, %9 : vector<16x32xf32>
    %c0_8 = arith.constant 0 : index
    %c0_9 = arith.constant 0 : index
    %11 = vector.load %arg5[%c0_8, %c0_9] : memref<1x32xf32, #tpu.memory_space<vmem>>, vector<1x32xf32>
    %12 = vector.broadcast %11 : vector<1x32xf32> to vector<16x32xf32>
    %13 = arith.addf %10, %12 : vector<16x32xf32>
    %cst_10 = arith.constant 0.000000e+00 : f32
    %14 = vector.broadcast %cst_10 : f32 to vector<16x32xf32>
    %15 = arith.maximumf %13, %14 : vector<16x32xf32>
    %16 = arith.truncf %15 : vector<16x32xf32> to vector<16x32xbf16>
    %c0_11 = arith.constant 0 : index
    %c0_12 = arith.constant 0 : index
    %17 = vector.load %arg6[%c0_11, %c0_12] : memref<32x32xbf16, #tpu.memory_space<vmem>>, vector<32x32xbf16>
    %cst_13 = arith.constant dense<0.000000e+00> : vector<16x32xf32>
    %18 = tpu.matmul %16, %17, %cst_13 {dimension_numbers = #tpu.dot_dimension_numbers<[1], [0], [0], [1], [0, 0, 1, 1], [], []>} : vector<16x32xbf16>, vector<32x32xbf16>, vector<16x32xf32> -> vector<16x32xf32>
    %c0_14 = arith.constant 0 : index
    %c0_15 = arith.constant 0 : index
    %19 = vector.load %arg7[%c0_14, %c0_15] : memref<1x32xf32, #tpu.memory_space<vmem>>, vector<1x32xf32>
    %20 = vector.broadcast %19 : vector<1x32xf32> to vector<16x32xf32>
    %21 = arith.addf %18, %20 : vector<16x32xf32>
    %cst_16 = arith.constant 0.000000e+00 : f32
    %22 = vector.broadcast %cst_16 : f32 to vector<16x32xf32>
    %23 = arith.maximumf %21, %22 : vector<16x32xf32>
    %c0_17 = arith.constant 0 : index
    %c0_18 = arith.constant 0 : index
    %24 = vector.load %arg8[%c0_17, %c0_18] : memref<1x32xf32, #tpu.memory_space<vmem>>, vector<1x32xf32>
    %25 = vector.broadcast %24 : vector<1x32xf32> to vector<16x32xf32>
    %26 = arith.mulf %23, %25 : vector<16x32xf32>
    %cst_19 = arith.constant dense<0.000000e+00> : vector<16xf32>
    %27 = vector.multi_reduction <add>, %26, %cst_19 [1] : vector<16x32xf32> to vector<16xf32>
    %28 = vector.shape_cast %27 : vector<16xf32> to vector<16x1xf32>
    %c0_20 = arith.constant 0 : index
    %c0_21 = arith.constant 0 : index
    %29 = vector.load %arg9[%c0_20, %c0_21] : memref<1x1xf32, #tpu.memory_space<vmem>>, vector<1x1xf32>
    %30 = vector.broadcast %29 : vector<1x1xf32> to vector<16x1xf32>
    %31 = arith.addf %28, %30 : vector<16x1xf32>
    %32 = arith.negf %31 : vector<16x1xf32>
    %33 = math.exp %32 : vector<16x1xf32>
    %cst_22 = arith.constant 1.000000e+00 : f32
    %34 = vector.broadcast %cst_22 : f32 to vector<16x1xf32>
    %35 = arith.addf %34, %33 : vector<16x1xf32>
    %36 = arith.divf %34, %35 : vector<16x1xf32>
    %37 = tpu.transpose %36, [1, 0] : vector<16x1xf32> -> vector<1x16xf32>
    %c0_23 = arith.constant 0 : index
    %c0_24 = arith.constant 0 : index
    %c0_25 = arith.constant 0 : index
    %38 = vector.load %arg10[%c0_23, %c0_24, %c0_25] : memref<1x1x16xf32, #tpu.memory_space<vmem>>, vector<1x1x16xf32>
    %39 = vector.shape_cast %38 : vector<1x1x16xf32> to vector<1x16xf32>
    %40 = vector.shape_cast %37 : vector<1x16xf32> to vector<1x1x16xf32>
    tpu.vector_store %arg10[%c0_23, %c0_24, %c0_25], %40 {strides = array<i32>} : memref<1x1x16xf32, #tpu.memory_space<vmem>>, vector<1x1x16xf32>,
    return
  }
  func.func @transform_0(%arg0: i32) -> (i32, i32) {
    %c0_i32 = arith.constant 0 : i32
    %c0_i32_0 = arith.constant 0 : i32
    return %arg0, %c0_i32 : i32, i32
  }
  func.func @transform_1(%arg0: i32) -> (i32, i32, i32) {
    %c0_i32 = arith.constant 0 : i32
    %c0_i32_0 = arith.constant 0 : i32
    %c0_i32_1 = arith.constant 0 : i32
    return %arg0, %c0_i32, %c0_i32_0 : i32, i32, i32
  }
  func.func @transform_2(%arg0: i32) -> (i32, i32) {
    %c0_i32 = arith.constant 0 : i32
    %c0_i32_0 = arith.constant 0 : i32
    %c0_i32_1 = arith.constant 0 : i32
    return %c0_i32, %c0_i32_0 : i32, i32
  }
  func.func @transform_3(%arg0: i32) -> (i32, i32) {
    %c0_i32 = arith.constant 0 : i32
    %c0_i32_0 = arith.constant 0 : i32
    %c0_i32_1 = arith.constant 0 : i32
    return %c0_i32, %c0_i32_0 : i32, i32
  }
  func.func @transform_4(%arg0: i32) -> (i32, i32) {
    %c0_i32 = arith.constant 0 : i32
    %c0_i32_0 = arith.constant 0 : i32
    %c0_i32_1 = arith.constant 0 : i32
    return %c0_i32, %c0_i32_0 : i32, i32
  }
  func.func @transform_5(%arg0: i32) -> (i32, i32) {
    %c0_i32 = arith.constant 0 : i32
    %c0_i32_0 = arith.constant 0 : i32
    %c0_i32_1 = arith.constant 0 : i32
    return %c0_i32, %c0_i32_0 : i32, i32
  }
  func.func @transform_6(%arg0: i32) -> (i32, i32) {
    %c0_i32 = arith.constant 0 : i32
    %c0_i32_0 = arith.constant 0 : i32
    %c0_i32_1 = arith.constant 0 : i32
    return %c0_i32, %c0_i32_0 : i32, i32
  }
  func.func @transform_7(%arg0: i32) -> (i32, i32) {
    %c0_i32 = arith.constant 0 : i32
    %c0_i32_0 = arith.constant 0 : i32
    %c0_i32_1 = arith.constant 0 : i32
    return %c0_i32, %c0_i32_0 : i32, i32
  }
  func.func @transform_8(%arg0: i32) -> (i32, i32) {
    %c0_i32 = arith.constant 0 : i32
    %c0_i32_0 = arith.constant 0 : i32
    %c0_i32_1 = arith.constant 0 : i32
    return %c0_i32, %c0_i32_0 : i32, i32
  }
  func.func @transform_9(%arg0: i32) -> (i32, i32, i32) {
    %c0_i32 = arith.constant 0 : i32
    %c0_i32_0 = arith.constant 0 : i32
    %c0_i32_1 = arith.constant 0 : i32
    return %arg0, %c0_i32, %c0_i32_0 : i32, i32, i32
  }
}

</mosaic_0001>

<bundles_post_ra>
// kernel: tpu_custom_call.1
= control target key start
LH: loop header
LB: loop body
LE: loop exit
PB: predicated region body
PF: predicated region fallthrough
CT: control target
= control target key end

     0   :  { %s982_s0 = inlined_call_operand.vmem [shape: bf16[64,32], index: 0, kind: input, shape index: {}]   ;;  %s983_s1 = inlined_call_operand.vmem [shape: f32[4,1,16], index: 1, kind: input, shape index: {}]   ;;  %s984_s2 = inlined_call_operand.vmem [shape: bf16[32,32], index: 2, kind: input, shape index: {}]   ;;  %s985_s3 = inlined_call_operand.vmem [shape: f32[1,32], index: 3, kind: input, shape index: {}]   ;;  %s986_s4 = inlined_call_operand.vmem [shape: f32[1,32], index: 4, kind: input, shape index: {}]   ;;  %s987_s5 = inlined_call_operand.vmem [shape: bf16[32,32], index: 5, kind: input, shape index: {}]   ;;  %s988_s6 = inlined_call_operand.vmem [shape: f32[1,32], index: 6, kind: input, shape index: {}]   ;;  %s989_s7 = inlined_call_operand.vmem [shape: f32[1,32], index: 7, kind: input, shape index: {}]   ;;  %s990_s8 = inlined_call_operand.<no memory space> [shape: f32[1,1], index: 8, kind: input, shape index: {}]   ;;  %s991_s9 = inlined_call_operand.hbm [shape: f32[4,1,16], index: 9, kind: output, shape index: {}]  }
   0x1   :  { %v14_v0 = vstv %s990_s8 }
   0x2   :  { %15 = vst [vmem:[#allocation2] sm:$0x1] %v14_v0 }
   0x3   :  { %16 = vsyncpa [#allocation4], 0 }
   0x4   :  { %18 = vsyncpa [#allocation4 + $0x1], 0  ;;  %s865_s11 = smov 0   ;;  %s867_s12 = smov 0  }
   0x5   :  { %s869_s13 = smov 0   ;;  %s871_s14 = smov 0  }
   0x6 LB: > { %s886_s8 = sadd.s32 4294967295, %s809_s14   ;;  %s654_s15 = sadd.s32 4294967294, %s809_s14   ;;  %s809_s14 = sphi %s871_s14, %s997_s14   ;;  %s805_s13 = sphi %s869_s13, %s996_s13   ;;  %s801_s12 = sphi %s867_s12, %s995_s12   ;;  %s797_s11 = sphi %s865_s11, %s994_s11  }
   0x7   : > { %s890_s16 = sadd.s32 1, %s809_s14   ;;  %s230_s17 = sadd.s32 1, %s805_s13 }
   0x8   : > { %s227_s18 = ssub.s32 %s809_s14, %s890_s16  ;;  %p240_p0 = scmp.ne.s32.totalorder %s805_s13, %s801_s12 }
   0x9   : > { %p228_p1 = scmp.eq.s32.totalorder %s227_s18, 0  ;;  %p241_p2 = scmp.eq.s32.totalorder %s886_s8, 3 }
   0xa   : > { %p246_p3 = scmp.ne.s32.totalorder %s801_s12, %s797_s11  ;;  %p247_p4 = scmp.eq.s32.totalorder %s654_s15, 3 }
   0xb   : > { %s901_s19 = scalar_select %p228_p1, %s805_s13, %s230_s17  }
   0xc   : > { %p903_p5 = por %p241_p2, %p240_p0  ;;  %p907_p6 = por %p247_p4, %p246_p3 }
   0xd   : > { %p657_p7 = scmp.ge.s32.totalorder %s809_s14, 1  ;;  %p301_p8 = scmp.lt.s32.totalorder %s809_s14, 5 }
   0xf   : > { %p302_p9 = pnand %p657_p7, %p301_p8 }
  0x10   : > { %p345_p10 = scmp.lt.s32.totalorder (!%p302_p9), %s886_s8, 3  ;;  %s658_s24 = sshll.u32 (!%p302_p9), %s886_s8, 1 }
  0x11   : > { %305 = sbr.rel (%p302_p9) target bundleno = 760 (0x2f8), region = 56  ;;  %p340_p11 = scmp.lt.s32.totalorder (!%p302_p9), %s658_s24, 7 }
  0x16   : > { %v688_v1 = vld [vmem:[%s984_s2 + $0x8] sm:$0xff]  ;;  %s346_s25 = scalar_select %p345_p10, %s886_s8, 3  ;;  %v687_v2 = vld [vmem:[%s984_s2] sm:$0xff]  ;;  %v811_v3 = vmov 0   ;;  %vm421_vm0 = vcmask 261120   ;;  %vm575_vm9 = vcmask 122880  }
  0x17   : > { %431 = vmatpush.bf16.msra.mxu0 %v688_v1  ;;  %733 = vset.pattern.permute.xlu1 %v811_v3  ;;  %s999_s24 = smov (!%p340_p11, %s658_s24), 7  ;;  %v690_v8 = vld [vmem:[%s987_s5 + $0x8] sm:$0xff]  ;;  %v689_v9 = vld [vmem:[%s987_s5] sm:$0xff] }
  0x18   : > { %s347_s30 = scalar_lea.vmem %s983_s1, %s346_s25  ;;  %s659_s10 = sshll.u32 %s999_s24, 2  ;;  %477 = vmatpush.bf16.msra.mxu1 %v690_v8  ;;  %v734_v10 = vld [vmem:[%s985_s3] ss:$0 sm:$0xff] }
  0x19   : > { %v355_v4 = vld [vmem:[%s347_s30] sm:$0x1]  ;;  %s343_s18 = scalar_lea.vmem %s982_s0, %s659_s10  ;;  %s586_s24 = scalar_lea.hbm %s991_s9, %s886_s8 }
  0x1a   : > { %356 = vxpose.xlu0.b32.start.end [1/1] (short) (narrow) %v355_v4, 16  ;;  %v686_v5 = vld [vmem:[%s343_s18] sm:$0xff]  ;;  %s337_s18 = sand.u32 1, %s801_s12   ;;  %s590_s27 = sshll.u32 %s586_s24, 4  ;;  %s591_s27 = int_to_ptr.hbm [resolvable:$true] %s590_s27 }
  0x1b   : > { %432 = vmatpush.bf16.msra.mxu0 %v687_v2  ;;  %v735_v14 = vld [vmem:[%s986_s4] ss:$0 sm:$0xff]  ;;  %s338_s25 = scalar_lea.vmem [#allocation3], %s337_s18  ;;  %s578_s28 = scalar_lea.sflag [#allocation4], %s337_s18 }
  0x1c   : > { %478 = vmatpush.bf16.msra.mxu1 %v689_v9  ;;  %v736_v25 = vld [vmem:[%s988_s6] ss:$0 sm:$0xff]  ;;  %s588_s26 = sshll.u32 %s338_s25, 4  ;;  %s761_s29 = sshra.s32 %s591_s27, 4  ;;  %s589_s26 = int_to_ptr.vmem [resolvable:$true] %s588_s26  ;;  %s762_s29 = int_to_ptr.hbm [resolvable:$true] %s761_s29 }
  0x1d   : > { %v737_v28 = vld [vmem:[%s989_s7] ss:$0 sm:$0xff]  ;;  %s763_s30 = scalar_lea.hbm %s762_s29, 1  ;;  %s767_s8 = scalar_lea.hbm %s991_s9, 4 }
  0x1e   : > { %672 = vmatmul.msk.bf16.vlgmr.msra.gmra.mxu0 %vm421_vm0, %v686_v5  ;;  %v738_v37 = vld [vmem:[#allocation2] ss:$0 sm:$0xff]  ;;  %p764_p12 = scmp.ne.s32.totalorder %s762_s29, %s763_s30  ;;  %p768_p1 = scmp.lt.s32.totalorder %s762_s29, %s991_s9 }
  0x1f   : > { %p769_p2 = scmp.lt.s32.totalorder %s767_s8, %s763_s30 }
  0x20   : > { %p765_p13 = pnand %p764_p12, %p903_p5 }
  0x21   : > { %p770_p3 = por %p769_p2, %p768_p1 }
  0x22   : > { %p766_p0 = pneg %p765_p13 }
  0x24   : > { %p771_p4 = pnand %p770_p3, %p766_p0 }
  0x81   : > { %732 = vset.pattern.permute.xlu0 %v811_v3 }
  0x9b   : > { %v434_v11 = vpop.f32.mrf.mxu0 }
  0xa3   : > { %v436_v18 = vpop.f32.mrf.mxu0 }
  0xbe   : > { %v372_v6 = vpop.trf.xlu0 }
  0xbf   : > { %391 = vperm.xlu0 %732, %v372_v6  }
  0xc6   : > { %v373_v7 = vpop.trf.xlu0 }
  0xc7   : > { %396 = vperm.xlu1 %733, %v373_v7  }
 0x131   : > { %v392_v12 = vpop.permute.xlu0 %391 }
 0x132   : > { %v402_v13 = vmul.f32 %v734_v10, %v392_v12 }
 0x134   : > { %v435_v15 = vadd.f32 %v434_v11, %v402_v13 }
 0x136   : > { %v443_v19 = vadd.f32 %v735_v14, %v435_v15 }
 0x138   : > { %v445_v22 = vmax.f32 %v443_v19, 0.0 }
 0x139   : > { %v397_v16 = vpop.permute.xlu1 %396 }
 0x13a   : > { %v403_v17 = vmul.f32 %v734_v10, %v397_v16 }
 0x13c   : > { %v437_v20 = vadd.f32 %v436_v18, %v403_v17 }
 0x13e   : > { %v444_v21 = vadd.f32 %v735_v14, %v437_v20 }
 0x140   : > { %v446_v23 = vmax.f32 %v444_v21, 0.0 }
 0x142   : > { %v447_v24 = vpack.c.bf16 %v446_v23, %v445_v22 }
 0x144   : > { %681 = vmatmul.msk.bf16.vlgmr.msra.gmra.mxu1 %vm421_vm0, %v447_v24 }
 0x1c1   : > { %v480_v26 = vpop.f32.mrf.mxu1 }
 0x1c2   : > { %v481_v27 = vadd.f32 %v736_v25, %v480_v26 }
 0x1c4   : > { %v485_v29 = vmax.f32 %v481_v27, 0.0 }
 0x1c6   : > { %v491_v30 = vmul.f32 %v737_v28, %v485_v29 }
 0x1c8   : > { %v493_v31 = vsel %vm421_vm0, %v491_v30, 0.0 }
 0x1c9   : > { %v482_v32 = vpop.f32.mrf.mxu1  ;;  %494 = vadd.xlane.f32.xlu1 %v493_v31 }
 0x1ca   : > { %v483_v33 = vadd.f32 %v736_v25, %v482_v32 }
 0x1cc   : > { %v486_v34 = vmax.f32 %v483_v33, 0.0 }
 0x1ce   : > { %v492_v35 = vmul.f32 %v737_v28, %v486_v34 }
 0x1d0   : > { %v496_v36 = vsel %vm421_vm0, %v492_v35, 0.0 }
 0x1d1   : > { %497 = vadd.xlane.f32.xlu2 %v496_v36 }
 0x23c   : > { %v495_v38 = vpop.xlane.xlu1 %494 }
 0x23d   : > { %v503_v39 = vadd.f32 %v738_v37, %v495_v38 }
 0x23f   : > { %v682_v40 = vmul.f32 -1.442695, %v503_v39 }
 0x241   : > { %739 = vpow2.f32 %v682_v40 }
 0x244   : > { %v498_v41 = vpop.xlane.xlu2 %497 }
 0x245   : > { %v504_v42 = vadd.f32 %v738_v37, %v498_v41 }
 0x247   : > { %v740_v43 = vpop.eup %739  ;;  %v683_v44 = vmul.f32 -1.442695, %v504_v42 }
 0x248   : > { %v511_v45 = vadd.f32 1.0, %v740_v43 }
 0x249   : > { %741 = vpow2.f32 %v683_v44 }
 0x24a   : > { %743 = vrcp.f32 %v511_v45  ;;  %v524_v51 = vand.u32 2147483648, %v511_v45  ;;  %v522_v53 = vand.u32 2147483647, %v511_v45  ;;  %vm518_vm2 = vweird.f32 %v511_v45 }
 0x24c   : > { %v525_v56 = vor.u32 1.1754944e-38, %v524_v51  ;;  %vm523_vm4 = vcmp.eq.f32.partialorder %v522_v53, 8.507059e+37 }
 0x24f   : > { %v742_v46 = vpop.eup %741 }
 0x250   : > { %v744_v47 = vpop.eup %743  ;;  %v512_v48 = vadd.f32 1.0, %v742_v46 }
 0x251   : > { %v514_v49 = vmul.f32 %v744_v47, %v511_v45  ;;  %vm519_vm1 = vweird.f32 %v744_v47 }
 0x252   : > { %745 = vrcp.f32 %v512_v48  ;;  %vm520_vm3 = vmor %vm518_vm2, %vm519_vm1  ;;  %v539_v61 = vand.u32 2147483648, %v512_v48  ;;  %v537_v63 = vand.u32 2147483647, %v512_v48  ;;  %vm533_vm6 = vweird.f32 %v512_v48 }
 0x253   : > { %v515_v50 = vsub.f32 1.0, %v514_v49 }
 0x254   : > { %v540_v1 = vor.u32 1.1754944e-38, %v539_v61  ;;  %vm538_vm8 = vcmp.eq.f32.partialorder %v537_v63, 8.507059e+37 }
 0x255   : > { %v516_v52 = vmul.f32 %v744_v47, %v515_v50 }
 0x257   : > { %v517_v54 = vadd.f32 %v744_v47, %v516_v52 }
 0x258   : > { %v746_v55 = vpop.eup %745 }
 0x259   : > { %v521_v57 = vsel %vm520_vm3, %v744_v47, %v517_v54  ;;  %v529_v58 = vmul.f32 %v746_v55, %v512_v48  ;;  %vm534_vm5 = vweird.f32 %v746_v55 }
 0x25a   : > { %v526_v59 = vsel %vm523_vm4, %v525_v56, %v521_v57  ;;  %vm535_vm7 = vmor %vm533_vm6, %vm534_vm5 }
 0x25b   : > { %543 = vxpose.xlu2.b32.start [1/2] (short) (narrow) %v526_v59, 8  ;;  %v530_v60 = vsub.f32 1.0, %v529_v58 }
 0x25d   : > { %v531_v62 = vmul.f32 %v746_v55, %v530_v60 }
 0x25f   : > { %v532_v0 = vadd.f32 %v746_v55, %v531_v62 }
 0x261   : > { %v536_v2 = vsel %vm535_vm7, %v746_v55, %v532_v0 }
 0x262   : > { %v541_v3 = vsel %vm538_vm8, %v540_v1, %v536_v2 }
 0x263   : > { %544 = vxpose.xlu2.b32.end [2/2] (short) (narrow) %v541_v3, 8 }
 0x2f4   : > { %v559_v4 = vpop.trf.xlu2 }
 0x2f5   : > { %576 = vst.msk [vmem:[%s338_s25] sm:$0x1] %vm575_vm9, %v559_v4 }
 0x2f6   : > { %774 = shalt.err (!%p771_p4)
}
 0x2f7   : > { %691 = dma.vmem_to_hbm [thread:$0]  (%p903_p5), %s589_s26, 16, %s591_s27, %s578_s28  }
 0x2f8 PF: > { %p697_p7 = scmp.ge.s32.totalorder %s809_s14, 2  ;;  %s602_s18 = sand.u32 1, %s797_s11  }
 0x2f9   : > { %s603_s23 = scalar_lea.sflag [#allocation4], %s602_s18 }
 0x2fa   : > { %p694_p8 = pnand %p697_p7, %p907_p6 }
 0x2fc   : > { %p695_p9 = pneg %p694_p8 }
 0x2fe   : > { %792 = dma.done.wait (%p695_p9), %s603_s23, 16  }
 0x2ff   : > { %794 = vsyncadd (%p695_p9), %s603_s23, 4294967280  ;;  %p21_p10 = scmp.ge.s32.totalorder %s890_s16, 6   ;;  %s994_s11 = smov %s801_s12 }
 0x300   : > { %s995_s12 = smov %s805_s13  ;;  %s996_s13 = smov %s901_s19 }
 0x301   : > { %s997_s14 = smov %s890_s16  ;;  %23 = sbr.rel (!%p21_p10) target bundleno = 6 (0x6), region = 94 }
 0x306   :  { %608 = vsyncpa [#allocation4], 1 }
 0x307   :  { %610 = vsyncpa [#allocation4 + $0x1], 1 }

</bundles_post_ra>
